<compile_context>
chip_gen: v5e
topology: v5e:2x2
jax: 0.10.0
libtpu: 0.0.40
codegen_flags: <defaults>
</compile_context>

<pallas_src>
import numpy as np
import jax
import jax.numpy as jnp
from jax.experimental import pallas as pl
from jax.experimental.pallas import tpu as pltpu


def _zrot_kernel(a_ref, b_ref, keep_ref, x_ref, o_ref):
    """Rotate one (TB, 3, tile_n) slab around the z axis.

    a_ref / b_ref / keep_ref : (TB, 3, 1) f32 coefficient planes in VMEM.
    x_ref / o_ref            : (TB, 3, tile_n) tiles in VMEM.

    Per batch element:
      row 0:  c*x0 + s*x1
      row 1: -s*x0 + c*x1
      row 2:  x2
    encoded as  y = keep*x + a*x0 + b*x1  with pure lane/sublane broadcasting.
    """
    x = x_ref[...].astype(jnp.float32)          # (TB, 3, T) dense load
    x0 = x[:, 0:1, :]                           # (TB, 1, T)
    x1 = x[:, 1:2, :]                           # (TB, 1, T)
    y = keep_ref[...] * x + a_ref[...] * x0 + b_ref[...] * x1
    o_ref[...] = y.astype(o_ref.dtype)          # single dense store


def random_zrotation(x, key, max_angle=np.pi, training=True,
                     tile_b=None, tile_n=None, donate_x=False):
    """Pallas TPU implementation of RandomZrotation.forward."""
    if not training:
        return x

    bs, c, n = x.shape
    assert c == 3

    # Per-batch random angles (tiny glue in plain JAX, deterministic via key).
    # TODO(synk): torch.rand RNG stream is not reproduced bit-exactly (jax.random used).
    angles = (2.0 * jax.random.uniform(key, (bs,), dtype=jnp.float32) - 1.0) * max_angle
    cos = jnp.cos(angles)
    sin = jnp.sin(angles)
    zeros = jnp.zeros_like(cos)
    ones = jnp.ones_like(cos)

    # Coefficient planes, (bs, 3, 1) f32:
    #   a multiplies x0, b multiplies x1, keep passes the z channel through.
    a_coef = jnp.stack([cos, -sin, zeros], axis=1)[:, :, None]
    b_coef = jnp.stack([sin, cos, zeros], axis=1)[:, :, None]
    keep = jnp.stack([zeros, zeros, ones], axis=1)[:, :, None]

    itemsize = jnp.dtype(x.dtype).itemsize

    # ---- Tile sizing: target ~2 MiB of x payload per grid step -------------
    target_step_bytes = 2 << 20

    if tile_n is None:
        # Largest lane extent whose payload alone fits the target, as a
        # multiple of 128 (or the full extent, which also covers n % 128 != 0).
        lane_cap = max(128, (target_step_bytes // (3 * itemsize)) // 128 * 128)
        if n <= lane_cap:
            tile_n = n
        else:
            tile_n = lane_cap
            # Prefer a divisor of n (multiple of 128, not too small) so the
            # trailing column block stays full and lane-dense.
            for cand in range(lane_cap, max(lane_cap // 2, 128) - 1, -128):
                if n % cand == 0:
                    tile_n = cand
                    break

    if tile_b is None:
        bytes_per_batch_row = 3 * tile_n * itemsize
        tile_b = int(max(1, min(bs, target_step_bytes // max(bytes_per_batch_row, 1))))

    grid_b = pl.cdiv(bs, tile_b)
    grid_n = pl.cdiv(n, tile_n)

    # Keep >=2 parallel grid steps when possible so both v7x TensorCores work.
    if grid_b * grid_n < 2 and bs >= 2:
        tile_b = pl.cdiv(bs, 2)
        grid_b = pl.cdiv(bs, tile_b)

    grid = (grid_b, grid_n)

    # ---- VMEM budget (channel dim 3 pads to 8 sublanes, 2 arrays x 2 bufs) --
    blocked_bytes = 2 * 2 * tile_b * 8 * tile_n * itemsize + 4 * tile_b * 8 * 3 * 4
    vmem_limit = int(min(max(blocked_bytes + (8 << 20), 32 << 20), 64 << 20))

    cost = pl.CostEstimate(
        flops=15 * bs * n,
        transcendentals=0,
        bytes_accessed=2 * bs * 3 * n * itemsize + 3 * bs * 3 * 4,
    )

    coef_spec = pl.BlockSpec((tile_b, 3, 1), lambda bi, ni: (bi, 0, 0))
    x_spec = pl.BlockSpec((tile_b, 3, tile_n), lambda bi, ni: (bi, 0, ni))

    out = pl.pallas_call(
        _zrot_kernel,
        out_shape=jax.ShapeDtypeStruct((bs, 3, n), x.dtype),
        grid=grid,
        in_specs=[coef_spec, coef_spec, coef_spec, x_spec],
        out_specs=x_spec,
        compiler_params=pltpu.CompilerParams(
            dimension_semantics=("parallel", "parallel"),
            vmem_limit_bytes=vmem_limit),
        cost_estimate=cost,
        input_output_aliases=({3: 0} if donate_x else {}),
    )(a_coef, b_coef, keep, x)
    return out


def _reference(x, key, max_angle=np.pi):
    bs, c, n = x.shape
    angles = (2.0 * jax.random.uniform(key, (bs,), dtype=jnp.float32) - 1.0) * max_angle
    cos = jnp.cos(angles)
    sin = jnp.sin(angles)
    R = jnp.zeros((bs, 3, 3), dtype=jnp.float32)
    R = R.at[:, 2, 2].set(1.0)
    R = R.at[:, 0, 0].set(cos)
    R = R.at[:, 1, 1].set(cos)
    R = R.at[:, 0, 1].set(sin)
    R = R.at[:, 1, 0].set(-sin)
    return jnp.einsum("bij,bjn->bin", R, x.astype(jnp.float32))


if __name__ == "__main__":
    key = jax.random.PRNGKey(0)
    k_x, k_angle = jax.random.split(key)

    # Small case: single column block, batch split across 2 grid steps.
    bs, c, n = 2, 3, 256
    x = jax.random.normal(k_x, (bs, c, n), dtype=jnp.float32)
    y = jax.block_until_ready(random_zrotation(x, k_angle, max_angle=np.pi, training=True))
    np.testing.assert_allclose(np.asarray(y), np.asarray(_reference(x, k_angle)),
                               rtol=1e-5, atol=1e-5)

    # Multi-tile case: explicit batch + lane tiling (2x4 grid).
    x2 = jax.random.normal(k_x, (4, 3, 4096), dtype=jnp.float32)
    y2 = jax.block_until_ready(random_zrotation(x2, k_angle, tile_b=2, tile_n=1024))
    np.testing.assert_allclose(np.asarray(y2), np.asarray(_reference(x2, k_angle)),
                               rtol=1e-5, atol=1e-5)

    # Partial batch block (bs not a multiple of tile_b) -> masked writeback.
    x3 = jax.random.normal(k_x, (3, 3, 384), dtype=jnp.float32)
    y3 = jax.block_until_ready(random_zrotation(x3, k_angle, tile_b=2, tile_n=384))
    np.testing.assert_allclose(np.asarray(y3), np.asarray(_reference(x3, k_angle)),
                               rtol=1e-5, atol=1e-5)

    # n not a multiple of 128 (full-width lane block covers it).
    x4 = jax.random.normal(k_x, (2, 3, 200), dtype=jnp.float32)
    y4 = jax.block_until_ready(random_zrotation(x4, k_angle))
    np.testing.assert_allclose(np.asarray(y4), np.asarray(_reference(x4, k_angle)),
                               rtol=1e-5, atol=1e-5)

    # bf16 I/O (f32 math in-kernel, cast on store).
    xb = jax.random.normal(k_x, (2, 3, 256), dtype=jnp.bfloat16)
    yb = jax.block_until_ready(random_zrotation(xb, k_angle))
    np.testing.assert_allclose(np.asarray(yb).astype(np.float32),
                               np.asarray(_reference(xb, k_angle)),
                               rtol=5e-2, atol=5e-2)

    # Eval mode is a passthrough.
    assert random_zrotation(x, k_angle, training=False) is x

    print("KERNEL_OK")
</pallas_src>

<mosaic_0001>
module attributes {stable_mosaic.version = 11 : i64} {
  func.func @_zrot_kernel(%arg0: i32, %arg1: i32, %arg2: memref<1x3x1xf32, #tpu.memory_space<vmem>>, %arg3: memref<1x3x1xf32, #tpu.memory_space<vmem>>, %arg4: memref<1x3x1xf32, #tpu.memory_space<vmem>>, %arg5: memref<1x3x256xf32, #tpu.memory_space<vmem>>, %arg6: memref<1x3x256xf32, #tpu.memory_space<vmem>>) attributes {dimension_semantics = [#tpu.dimension_semantics<parallel>, #tpu.dimension_semantics<parallel>], iteration_bounds = array<i64: 2, 1>, scalar_prefetch = 0 : i64, scratch_operands = 0 : i64, tpu.core_type = #tpu.core_type<tc>, window_params = [{transform_indices = @transform_0, window_bounds = array<i64: 1, 3, 1>}, {transform_indices = @transform_1, window_bounds = array<i64: 1, 3, 1>}, {transform_indices = @transform_2, window_bounds = array<i64: 1, 3, 1>}, {transform_indices = @transform_3, window_bounds = array<i64: 1, 3, 256>}, {transform_indices = @transform_4, window_bounds = array<i64: 1, 3, 256>}]} {
    %c0 = arith.constant 0 : index
    %c0_0 = arith.constant 0 : index
    %c0_1 = arith.constant 0 : index
    %0 = vector.load %arg5[%c0, %c0_0, %c0_1] : memref<1x3x256xf32, #tpu.memory_space<vmem>>, vector<1x3x256xf32>
    %1 = vector.extract_strided_slice %0 {offsets = [0, 0, 0], sizes = [1, 1, 256], strides = [1, 1, 1]} : vector<1x3x256xf32> to vector<1x1x256xf32>
    %2 = vector.extract_strided_slice %0 {offsets = [0, 1, 0], sizes = [1, 1, 256], strides = [1, 1, 1]} : vector<1x3x256xf32> to vector<1x1x256xf32>
    %c0_2 = arith.constant 0 : index
    %c0_3 = arith.constant 0 : index
    %c0_4 = arith.constant 0 : index
    %3 = vector.load %arg4[%c0_2, %c0_3, %c0_4] : memref<1x3x1xf32, #tpu.memory_space<vmem>>, vector<1x3x1xf32>
    %4 = vector.broadcast %3 : vector<1x3x1xf32> to vector<1x3x256xf32>
    %5 = arith.mulf %4, %0 : vector<1x3x256xf32>
    %c0_5 = arith.constant 0 : index
    %c0_6 = arith.constant 0 : index
    %c0_7 = arith.constant 0 : index
    %6 = vector.load %arg2[%c0_5, %c0_6, %c0_7] : memref<1x3x1xf32, #tpu.memory_space<vmem>>, vector<1x3x1xf32>
    %7 = vector.broadcast %6 : vector<1x3x1xf32> to vector<1x3x256xf32>
    %8 = vector.broadcast %1 : vector<1x1x256xf32> to vector<1x3x256xf32>
    %9 = arith.mulf %7, %8 : vector<1x3x256xf32>
    %10 = arith.addf %5, %9 : vector<1x3x256xf32>
    %c0_8 = arith.constant 0 : index
    %c0_9 = arith.constant 0 : index
    %c0_10 = arith.constant 0 : index
    %11 = vector.load %arg3[%c0_8, %c0_9, %c0_10] : memref<1x3x1xf32, #tpu.memory_space<vmem>>, vector<1x3x1xf32>
    %12 = vector.broadcast %11 : vector<1x3x1xf32> to vector<1x3x256xf32>
    %13 = vector.broadcast %2 : vector<1x1x256xf32> to vector<1x3x256xf32>
    %14 = arith.mulf %12, %13 : vector<1x3x256xf32>
    %15 = arith.addf %10, %14 : vector<1x3x256xf32>
    %c0_11 = arith.constant 0 : index
    %c0_12 = arith.constant 0 : index
    %c0_13 = arith.constant 0 : index
    %16 = vector.load %arg6[%c0_11, %c0_12, %c0_13] : memref<1x3x256xf32, #tpu.memory_space<vmem>>, vector<1x3x256xf32>
    tpu.vector_store %arg6[%c0_11, %c0_12, %c0_13], %15 {strides = array<i32>} : memref<1x3x256xf32, #tpu.memory_space<vmem>>, vector<1x3x256xf32>,
    return
  }
  func.func @transform_0(%arg0: i32, %arg1: i32) -> (i32, i32, i32) {
    %c0_i32 = arith.constant 0 : i32
    %c0_i32_0 = arith.constant 0 : i32
    %c0_i32_1 = arith.constant 0 : i32
    return %arg0, %c0_i32, %c0_i32_0 : i32, i32, i32
  }
  func.func @transform_1(%arg0: i32, %arg1: i32) -> (i32, i32, i32) {
    %c0_i32 = arith.constant 0 : i32
    %c0_i32_0 = arith.constant 0 : i32
    %c0_i32_1 = arith.constant 0 : i32
    return %arg0, %c0_i32, %c0_i32_0 : i32, i32, i32
  }
  func.func @transform_2(%arg0: i32, %arg1: i32) -> (i32, i32, i32) {
    %c0_i32 = arith.constant 0 : i32
    %c0_i32_0 = arith.constant 0 : i32
    %c0_i32_1 = arith.constant 0 : i32
    return %arg0, %c0_i32, %c0_i32_0 : i32, i32, i32
  }
  func.func @transform_3(%arg0: i32, %arg1: i32) -> (i32, i32, i32) {
    %c0_i32 = arith.constant 0 : i32
    %c0_i32_0 = arith.constant 0 : i32
    return %arg0, %c0_i32, %arg1 : i32, i32, i32
  }
  func.func @transform_4(%arg0: i32, %arg1: i32) -> (i32, i32, i32) {
    %c0_i32 = arith.constant 0 : i32
    %c0_i32_0 = arith.constant 0 : i32
    return %arg0, %c0_i32, %arg1 : i32, i32, i32
  }
}

</mosaic_0001>

<bundles_post_ra>
// kernel: tpu_custom_call.1
= control target key start
LH: loop header
LB: loop body
LE: loop exit
PB: predicated region body
PF: predicated region fallthrough
CT: control target
= control target key end

     0   :  { %s558_s15 = smov 0   ;;  %s560_s16 = smov 0   ;;  %s608_s0 = inlined_call_operand.vmem [shape: f32[2,3,1], index: 0, kind: input, shape index: {}]   ;;  %s609_s1 = inlined_call_operand.vmem [shape: f32[2,3,1], index: 1, kind: input, shape index: {}]   ;;  %s610_s2 = inlined_call_operand.vmem [shape: f32[2,3,1], index: 2, kind: input, shape index: {}]   ;;  %s611_s3 = inlined_call_operand.vmem [shape: f32[2,3,256], index: 3, kind: input, shape index: {}]   ;;  %s612_s4 = inlined_call_operand.vmem [shape: f32[2,3,256], index: 4, kind: output, shape index: {}]  }
   0x1   :  { %s562_s17 = smov 0  }
   0x2 LB: > { %s26_s18 = sadd.s32 1, %s526_s16  ;;  %p469_p0 = scmp.ge.s32.totalorder %s530_s17, 1  ;;  %s530_s17 = sphi %s562_s17, %s14_s17   ;;  %s526_s16 = sphi %s560_s16, %s614_s16   ;;  %s522_s15 = sphi %s558_s15, %s613_s15  }
   0x3   : > { %p28_p1 = scmp.ge.s32.totalorder %s26_s18, 2  ;;  %p210_p2 = scmp.lt.s32.totalorder %s530_s17, 3 }
   0x5   : > { %s616_s18 = smov (%p28_p1, %s26_s18), 0  ;;  %p211_p3 = pnand %p469_p0, %p210_p2 }
   0x6   : > { %p256_p4 = scmp.lt.s32.totalorder (!%p211_p3), %s522_s15, 1 }
   0x7   : > { %214 = sbr.rel (%p211_p3) target bundleno = 150 (0x96), region = 36 }
   0xc   : > { %v532_v0 = vmov 0   ;;  %s618_s15 = smov (!%p256_p4, %s522_s15), 1  ;;  %vm338_vm0 = vcmask 1043456  }
   0xd   : > { %506 = vset.pattern.permute.xlu0 %v532_v0  ;;  %507 = vset.pattern.permute.xlu1 %v532_v0  ;;  %s470_s19 = sshll.u32 %s618_s15, 2  ;;  %s479_s20 = sshll.u32 %s618_s15, 3 }
   0xe   : > { %s267_s23 = scalar_lea.vmem %s610_s2, %s470_s19  ;;  %s276_s26 = scalar_lea.vmem %s611_s3, %s479_s20 }
   0xf   : > { %v288_v1 = vld [vmem:[%s276_s26] sm:$0x77]  ;;  %s263_s29 = scalar_lea.vmem %s609_s1, %s470_s19  ;;  %s259_s6 = scalar_lea.vmem %s608_s0, %s470_s19 }
  0x10   : > { %v289_v2 = vld [vmem:[%s267_s23] sm:$0x7]  ;;  %296 = vst [vmem:[#allocation1] ss:$2 sm:$0xff] %v288_v1  ;;  %v309_v6 = vperm.slane %v288_v1, 0  ;;  %v310_v7 = vperm.slane %v288_v1, 4  ;;  %s286_s9 = scalar_lea.vmem %s612_s4, %s479_s20 }
  0x11   : > { %292 = vperm.xlu0 %506, %v289_v2   ;;  %v319_v3 = vld [vmem:[%s263_s29] sm:$0x7]  ;;  %v326_v8 = vperm.slane %v288_v1, 5  ;;  %v325_v9 = vperm.slane %v288_v1, 1 }
  0x12   : > { %322 = vperm.xlu1 %507, %v319_v3   ;;  %v303_v4 = vld [vmem:[%s259_s6] sm:$0x7]  ;;  %v313_v11 = vperm.slane %v309_v6, 0  ;;  %v314_v12 = vperm.slane %v310_v7, 0 }
  0x13   : > { %v330_v13 = vperm.slane %v326_v8, 1  ;;  %v329_v16 = vperm.slane %v325_v9, 1 }
  0x17   : > { %v297_v10 = vld.sshfl [vmem:[#allocation1] sm:$0xff pattern:$0x75316420]  ;;  %v298_v14 = vld.sshfl [vmem:[#allocation1 + $0x8] sm:$0xff pattern:$0x75316420] }
  0x19   : > { %306 = vperm.xlu0 %506, %v303_v4  }
  0x83   : > { %v293_v5 = vpop.permute.xlu0 %292 }
  0x84   : > { %v323_v15 = vpop.permute.xlu1 %322  ;;  %v301_v17 = vmul.f32 %v297_v10, %v293_v5  ;;  %v302_v19 = vmul.f32 %v298_v14, %v293_v5 }
  0x85   : > { %v332_v22 = vmul.f32 %v330_v13, %v323_v15  ;;  %v331_v25 = vmul.f32 %v329_v16, %v323_v15 }
  0x8b   : > { %v307_v18 = vpop.permute.xlu0 %306 }
  0x8c   : > { %v315_v20 = vmul.f32 %v313_v11, %v307_v18  ;;  %v316_v21 = vmul.f32 %v314_v12, %v307_v18 }
  0x8e   : > { %v317_v23 = vadd.f32 %v315_v20, %v301_v17  ;;  %v318_v24 = vadd.f32 %v316_v21, %v302_v19 }
  0x90   : > { %v334_v26 = vadd.f32 %v332_v22, %v318_v24  ;;  %v333_v27 = vadd.f32 %v331_v25, %v317_v23 }
  0x92   : > { %v337_v28 = vrot.slane %v334_v26, 4 }
  0x94   : > { %v339_v29 = vsel %vm338_vm0, %v333_v27, %v337_v28 }
  0x95   : > { %341 = vst [vmem:[%s286_s9] sm:$0x77] %v339_v29 }
  0x96 PF: > { %s14_s17 = sadd.s32 1, %s530_s17   ;;  %s613_s15 = smov %s526_s16 }
  0x97   : > { %p11_p5 = scmp.ge.s32.totalorder %s14_s17, 4   ;;  %s614_s16 = smov %s616_s18 }
  0x99   :  { %13 = sbr.rel (!%p11_p5) target bundleno = 2 (0x2), region = 75 }

</bundles_post_ra>
